<compile_context>
chip_gen: v7x
topology: tpu7x:2x2x1
jax: 0.10.0
libtpu: 0.0.40
codegen_flags: <defaults>
</compile_context>

<pallas_src>
import math
from functools import partial

import jax
import jax.numpy as jnp
from jax.experimental import pallas as pl
from jax.experimental.pallas import tpu as pltpu

EPS = 1e-6


def _vmem_limit_bytes():
    """~3/4 of physical VMEM (96 MiB on v5e/v6e, 48 MiB on v7x); safe fallback."""
    try:
        info = pltpu.get_tpu_info()
        cap = int(getattr(info, "vmem_capacity_bytes", 0))
        if cap > 0:
            return (cap * 3) // 4
    except Exception:
        pass
    return 48 * 1024 * 1024


def _layer_norm_f32(x, gamma, beta, eps):
    """torch-style LayerNorm: unbiased std, gamma*(x-mean)/(std+eps)+beta, f32."""
    d_model = x.shape[-1]
    mean = jnp.mean(x, axis=-1, keepdims=True)
    d = x - mean
    var = jnp.sum(d * d, axis=-1, keepdims=True) * (1.0 / (d_model - 1))
    inv = pl.reciprocal(jnp.sqrt(var) + eps, approx=True)      # EUP, ~free
    return gamma * d * inv + beta


# --------------------- fused decoder-layer kernel (per batch) ----------------
# One program per batch element:
#   LN0 -> QKV (one (D,3D) matmul) -> per-head attention folded into out-proj
#   -> +x -> LN1 -> W1 -> ReLU -> W2 -> +x

def _decoder_layer_kernel(x_ref, bias_ref, ln0g_ref, ln0b_ref,
                          wqkv_ref, bqkv_ref, wo_ref, bo_ref,
                          ln1g_ref, ln1b_ref, w1_ref, b1_ref, w2_ref, b2_ref,
                          o_ref, *, num_heads, eps, mask_batched):
    x = x_ref[...]                                   # (T, D) f32
    T, D = x.shape
    dk = D // num_heads
    scale = 1.0 / math.sqrt(dk)

    # additive attention bias, fetched & cast once per program (hoisted out of
    # the head loop).
    midx = pl.program_id(0) if mask_batched else 0
    bias = bias_ref[midx].astype(jnp.float32)        # (T, T)

    # -------- sublayer 0 : x + self_attn(LN0(x)) --------
    nx = _layer_norm_f32(x, ln0g_ref[...], ln0b_ref[...], eps)

    # fused Q/K/V projection: bf16 MXU operands, f32 accumulation.
    qkv = jnp.dot(nx.astype(jnp.bfloat16), wqkv_ref[...],
                  preferred_element_type=jnp.float32) + bqkv_ref[...]
    q = (qkv[:, 0:D] * scale).astype(jnp.bfloat16)   # scale folded into q (T,D)
    k = qkv[:, D:2 * D].astype(jnp.bfloat16)
    v = qkv[:, 2 * D:3 * D].astype(jnp.bfloat16)

    # accumulate the output projection head by head in registers — no (T, D)
    # scratch round trip, no masked lane-offset VMEM stores.
    attn = jnp.zeros((T, D), jnp.float32) + bo_ref[...]
    for h in range(num_heads):
        sl = slice(h * dk, (h + 1) * dk)
        # q_h · k_h^T without materializing a transpose: contract dim 1 of both.
        s = jax.lax.dot_general(q[:, sl], k[:, sl],
                                (((1,), (1,)), ((), ())),
                                preferred_element_type=jnp.float32)   # (T, T)
        s = s + bias
        s = s - jnp.max(s, axis=-1, keepdims=True)
        p = jnp.exp(s)
        p = p * pl.reciprocal(jnp.sum(p, axis=-1, keepdims=True), approx=True)
        ctx = jnp.dot(p.astype(jnp.bfloat16), v[:, sl],
                      preferred_element_type=jnp.float32)             # (T, dk)
        # fold this head straight into the output projection:
        # concat_h(ctx_h) @ Wo == sum_h ctx_h @ Wo[h*dk:(h+1)*dk, :]
        attn = attn + jnp.dot(ctx.astype(jnp.bfloat16),
                              wo_ref[h * dk:(h + 1) * dk, :],
                              preferred_element_type=jnp.float32)
    x = x + attn                                     # residual (dropout == identity)

    # -------- sublayer 1 : x + feed_forward(LN1(x)) --------
    nx = _layer_norm_f32(x, ln1g_ref[...], ln1b_ref[...], eps)
    hdd = jnp.dot(nx.astype(jnp.bfloat16), w1_ref[...],
                  preferred_element_type=jnp.float32) + b1_ref[...]
    hdd = jnp.maximum(hdd, 0.0)                      # (T, d_ff) stays in VMEM/vregs
    y = jnp.dot(hdd.astype(jnp.bfloat16), w2_ref[...],
                preferred_element_type=jnp.float32) + b2_ref[...]
    o_ref[...] = x + y                               # residual


def decoder_layer_pallas(x, tgt_mask, p, num_heads, eps=EPS):
    B, T, D = x.shape

    # normalize mask to (Bm, T, T) and turn it into a bf16 additive bias.
    mask = tgt_mask
    if mask.ndim == 4:                               # (B, 1, T, T)
        mask = mask[:, 0]
    if mask.ndim == 2:                               # (T, T)
        mask = mask[None]
    mask_batched = mask.shape[0] != 1
    bias = jnp.where(mask == 0, -1e9, 0.0).astype(jnp.bfloat16)

    # constant operands: whole-array VMEM residents → loaded once, not
    # double-buffered by the pipeline.
    vmem_const = pl.BlockSpec(memory_space=pltpu.MemorySpace.VMEM)

    return pl.pallas_call(
        partial(_decoder_layer_kernel, num_heads=num_heads, eps=eps,
                mask_batched=mask_batched),
        out_shape=jax.ShapeDtypeStruct((B, T, D), jnp.float32),
        grid=(B,),
        in_specs=[
            pl.BlockSpec((None, T, D), lambda b: (b, 0, 0)),   # x (pipelined)
            vmem_const,                                        # mask bias (bf16)
            vmem_const, vmem_const,                            # LN0 gamma/beta
            vmem_const, vmem_const,                            # W_qkv (bf16), b_qkv
            vmem_const, vmem_const,                            # W_o   (bf16), b_o
            vmem_const, vmem_const,                            # LN1 gamma/beta
            vmem_const, vmem_const,                            # W1 (bf16), b1
            vmem_const, vmem_const,                            # W2 (bf16), b2
        ],
        out_specs=pl.BlockSpec((None, T, D), lambda b: (b, 0, 0)),
        compiler_params=pltpu.CompilerParams(
            dimension_semantics=("parallel",),
            vmem_limit_bytes=_vmem_limit_bytes()),
    )(x, bias, p["ln0_g"], p["ln0_b"], p["wqkv"], p["bqkv"], p["wo"], p["bo"],
      p["ln1_g"], p["ln1_b"], p["ff_w1"], p["ff_b1"], p["ff_w2"], p["ff_b2"])


# ------------------------------- forward pass --------------------------------

def decoder_layer_forward(x, memory, src_mask, tgt_mask, params, *,
                          num_heads, kernel_arg):
    # src_mask (and src_attn) are unused by the reference DecoderLayer.forward.
    y = decoder_layer_pallas(x, tgt_mask, params, num_heads)   # both sublayers fused
    L = (8 - kernel_arg) ** 2
    out = y[:, L:, :]                                          # pure layout ops:
    return jnp.concatenate([memory, out], axis=1)              # handled by XLA


# ---------------------------- deterministic init ------------------------------

def init_params(key, d_model, d_ff, mxu_dtype=jnp.bfloat16):
    def dense(k, din, dout):
        w = jax.random.normal(k, (din, dout), jnp.float32) * 0.02
        return w, jnp.zeros((dout,), jnp.float32)

    ks = jax.random.split(key, 6)
    wq, bq = dense(ks[0], d_model, d_model)
    wk, bk = dense(ks[1], d_model, d_model)
    wv, bv = dense(ks[2], d_model, d_model)
    wo, bo = dense(ks[3], d_model, d_model)
    w1, b1 = dense(ks[4], d_model, d_ff)
    w2, b2 = dense(ks[5], d_ff, d_model)
    return dict(
        ln0_g=jnp.ones((1, d_model), jnp.float32),
        ln0_b=jnp.zeros((1, d_model), jnp.float32),
        wqkv=jnp.concatenate([wq, wk, wv], axis=1).astype(mxu_dtype),
        bqkv=jnp.concatenate([bq, bk, bv]).reshape(1, 3 * d_model),
        wo=wo.astype(mxu_dtype),
        bo=bo.reshape(1, d_model),
        ln1_g=jnp.ones((1, d_model), jnp.float32),
        ln1_b=jnp.zeros((1, d_model), jnp.float32),
        ff_w1=w1.astype(mxu_dtype),
        ff_b1=b1.reshape(1, d_ff),
        ff_w2=w2.astype(mxu_dtype),
        ff_b2=b2.reshape(1, d_model),
    )


if __name__ == "__main__":
    B, T, S, D, H, DFF = 2, 8, 8, 32, 4, 64
    KERNEL_ARG = 6                                   # args.kernel -> L = (8-6)**2 = 4

    key = jax.random.PRNGKey(0)
    kx, km, kp = jax.random.split(key, 3)
    x = jax.random.normal(kx, (B, T, D), jnp.float32)        # target activations
    memory = jax.random.normal(km, (B, S, D), jnp.float32)   # encoder memory
    src_mask = jnp.ones((B, 1, S), jnp.float32)              # unused by reference forward
    tgt_mask = jnp.tril(jnp.ones((T, T), jnp.float32))[None] # (1, T, T) causal mask

    params = init_params(kp, D, DFF)

    fwd = jax.jit(partial(decoder_layer_forward, num_heads=H, kernel_arg=KERNEL_ARG))
    out = fwd(x, memory, src_mask, tgt_mask, params)
    jax.block_until_ready(out)

    L = (8 - KERNEL_ARG) ** 2
    assert out.shape == (B, S + (T - L), D) and out.dtype == jnp.float32
    print("KERNEL_OK")
</pallas_src>

<mosaic_0001>
module attributes {stable_mosaic.version = 11 : i64} {
  func.func @_decoder_layer_kernel(%arg0: i32, %arg1: memref<1x8x32xf32, #tpu.memory_space<vmem>>, %arg2: memref<1x8x8xbf16, #tpu.memory_space<vmem>>, %arg3: memref<1x32xf32, #tpu.memory_space<vmem>>, %arg4: memref<1x32xf32, #tpu.memory_space<vmem>>, %arg5: memref<32x96xbf16, #tpu.memory_space<vmem>>, %arg6: memref<1x96xf32, #tpu.memory_space<vmem>>, %arg7: memref<32x32xbf16, #tpu.memory_space<vmem>>, %arg8: memref<1x32xf32, #tpu.memory_space<vmem>>, %arg9: memref<1x32xf32, #tpu.memory_space<vmem>>, %arg10: memref<1x32xf32, #tpu.memory_space<vmem>>, %arg11: memref<32x64xbf16, #tpu.memory_space<vmem>>, %arg12: memref<1x64xf32, #tpu.memory_space<vmem>>, %arg13: memref<64x32xbf16, #tpu.memory_space<vmem>>, %arg14: memref<1x32xf32, #tpu.memory_space<vmem>>, %arg15: memref<1x8x32xf32, #tpu.memory_space<vmem>>) attributes {dimension_semantics = [#tpu.dimension_semantics<parallel>], iteration_bounds = array<i64: 2>, scalar_prefetch = 0 : i64, scratch_operands = 0 : i64, tpu.core_type = #tpu.core_type<tc>, window_params = [{transform_indices = @transform_0, window_bounds = array<i64: 1, 8, 32>}, {pipeline_mode = #tpu.pipeline_mode<synchronous>, transform_indices = @transform_1, window_bounds = array<i64: 1, 8, 8>}, {pipeline_mode = #tpu.pipeline_mode<synchronous>, transform_indices = @transform_2, window_bounds = array<i64: 1, 32>}, {pipeline_mode = #tpu.pipeline_mode<synchronous>, transform_indices = @transform_3, window_bounds = array<i64: 1, 32>}, {pipeline_mode = #tpu.pipeline_mode<synchronous>, transform_indices = @transform_4, window_bounds = array<i64: 32, 96>}, {pipeline_mode = #tpu.pipeline_mode<synchronous>, transform_indices = @transform_5, window_bounds = array<i64: 1, 96>}, {pipeline_mode = #tpu.pipeline_mode<synchronous>, transform_indices = @transform_6, window_bounds = array<i64: 32, 32>}, {pipeline_mode = #tpu.pipeline_mode<synchronous>, transform_indices = @transform_7, window_bounds = array<i64: 1, 32>}, {pipeline_mode = #tpu.pipeline_mode<synchronous>, transform_indices = @transform_8, window_bounds = array<i64: 1, 32>}, {pipeline_mode = #tpu.pipeline_mode<synchronous>, transform_indices = @transform_9, window_bounds = array<i64: 1, 32>}, {pipeline_mode = #tpu.pipeline_mode<synchronous>, transform_indices = @transform_10, window_bounds = array<i64: 32, 64>}, {pipeline_mode = #tpu.pipeline_mode<synchronous>, transform_indices = @transform_11, window_bounds = array<i64: 1, 64>}, {pipeline_mode = #tpu.pipeline_mode<synchronous>, transform_indices = @transform_12, window_bounds = array<i64: 64, 32>}, {pipeline_mode = #tpu.pipeline_mode<synchronous>, transform_indices = @transform_13, window_bounds = array<i64: 1, 32>}, {transform_indices = @transform_14, window_bounds = array<i64: 1, 8, 32>}]} {
    %c0 = arith.constant 0 : index
    %c0_0 = arith.constant 0 : index
    %c0_1 = arith.constant 0 : index
    %0 = vector.load %arg1[%c0, %c0_0, %c0_1] : memref<1x8x32xf32, #tpu.memory_space<vmem>>, vector<1x8x32xf32>
    %1 = vector.shape_cast %0 : vector<1x8x32xf32> to vector<8x32xf32>
    %c0_2 = arith.constant 0 : index
    %c0_3 = arith.constant 0 : index
    %c0_4 = arith.constant 0 : index
    %2 = vector.load %arg2[%c0_2, %c0_3, %c0_4] : memref<1x8x8xbf16, #tpu.memory_space<vmem>>, vector<1x8x8xbf16>
    %3 = vector.shape_cast %2 : vector<1x8x8xbf16> to vector<8x8xbf16>
    %4 = arith.extf %3 : vector<8x8xbf16> to vector<8x8xf32>
    %c0_5 = arith.constant 0 : index
    %c0_6 = arith.constant 0 : index
    %5 = vector.load %arg3[%c0_5, %c0_6] : memref<1x32xf32, #tpu.memory_space<vmem>>, vector<1x32xf32>
    %c0_7 = arith.constant 0 : index
    %c0_8 = arith.constant 0 : index
    %6 = vector.load %arg4[%c0_7, %c0_8] : memref<1x32xf32, #tpu.memory_space<vmem>>, vector<1x32xf32>
    %cst = arith.constant dense<0.000000e+00> : vector<8xf32>
    %7 = vector.multi_reduction <add>, %1, %cst [1] : vector<8x32xf32> to vector<8xf32>
    %8 = vector.shape_cast %7 : vector<8xf32> to vector<8x1xf32>
    %cst_9 = arith.constant 3.200000e+01 : f32
    %9 = vector.broadcast %cst_9 : f32 to vector<8x1xf32>
    %10 = arith.divf %8, %9 : vector<8x1xf32>
    %11 = vector.broadcast %10 : vector<8x1xf32> to vector<8x32xf32>
    %12 = arith.subf %1, %11 : vector<8x32xf32>
    %13 = arith.mulf %12, %12 : vector<8x32xf32>
    %cst_10 = arith.constant dense<0.000000e+00> : vector<8xf32>
    %14 = vector.multi_reduction <add>, %13, %cst_10 [1] : vector<8x32xf32> to vector<8xf32>
    %15 = vector.shape_cast %14 : vector<8xf32> to vector<8x1xf32>
    %cst_11 = arith.constant 0.0322580636 : f32
    %16 = vector.broadcast %cst_11 : f32 to vector<8x1xf32>
    %17 = arith.mulf %15, %16 : vector<8x1xf32>
    %18 = math.sqrt %17 : vector<8x1xf32>
    %cst_12 = arith.constant 9.99999997E-7 : f32
    %19 = vector.broadcast %cst_12 : f32 to vector<8x1xf32>
    %20 = arith.addf %18, %19 : vector<8x1xf32>
    %21 = tpu.reciprocal %20 {approx = true} : vector<8x1xf32> -> vector<8x1xf32>
    %22 = vector.broadcast %5 : vector<1x32xf32> to vector<8x32xf32>
    %23 = arith.mulf %22, %12 : vector<8x32xf32>
    %24 = vector.broadcast %21 : vector<8x1xf32> to vector<8x32xf32>
    %25 = arith.mulf %23, %24 : vector<8x32xf32>
    %26 = vector.broadcast %6 : vector<1x32xf32> to vector<8x32xf32>
    %27 = arith.addf %25, %26 : vector<8x32xf32>
    %28 = arith.truncf %27 : vector<8x32xf32> to vector<8x32xbf16>
    %c0_13 = arith.constant 0 : index
    %c0_14 = arith.constant 0 : index
    %29 = vector.load %arg5[%c0_13, %c0_14] : memref<32x96xbf16, #tpu.memory_space<vmem>>, vector<32x96xbf16>
    %cst_15 = arith.constant dense<0.000000e+00> : vector<8x96xf32>
    %30 = tpu.matmul %28, %29, %cst_15 {dimension_numbers = #tpu.dot_dimension_numbers<[1], [0], [0], [1], [0, 0, 1, 1], [], []>} : vector<8x32xbf16>, vector<32x96xbf16>, vector<8x96xf32> -> vector<8x96xf32>
    %c0_16 = arith.constant 0 : index
    %c0_17 = arith.constant 0 : index
    %31 = vector.load %arg6[%c0_16, %c0_17] : memref<1x96xf32, #tpu.memory_space<vmem>>, vector<1x96xf32>
    %32 = vector.broadcast %31 : vector<1x96xf32> to vector<8x96xf32>
    %33 = arith.addf %30, %32 : vector<8x96xf32>
    %34 = vector.extract_strided_slice %33 {offsets = [0, 0], sizes = [8, 32], strides = [1, 1]} : vector<8x96xf32> to vector<8x32xf32>
    %cst_18 = arith.constant 0.353553385 : f32
    %35 = vector.broadcast %cst_18 : f32 to vector<8x32xf32>
    %36 = arith.mulf %34, %35 : vector<8x32xf32>
    %37 = arith.truncf %36 : vector<8x32xf32> to vector<8x32xbf16>
    %38 = vector.extract_strided_slice %33 {offsets = [0, 32], sizes = [8, 32], strides = [1, 1]} : vector<8x96xf32> to vector<8x32xf32>
    %39 = arith.truncf %38 : vector<8x32xf32> to vector<8x32xbf16>
    %40 = vector.extract_strided_slice %33 {offsets = [0, 64], sizes = [8, 32], strides = [1, 1]} : vector<8x96xf32> to vector<8x32xf32>
    %41 = arith.truncf %40 : vector<8x32xf32> to vector<8x32xbf16>
    %cst_19 = arith.constant 0.000000e+00 : f32
    %42 = vector.broadcast %cst_19 : f32 to vector<8x32xf32>
    %c0_20 = arith.constant 0 : index
    %c0_21 = arith.constant 0 : index
    %43 = vector.load %arg8[%c0_20, %c0_21] : memref<1x32xf32, #tpu.memory_space<vmem>>, vector<1x32xf32>
    %44 = vector.broadcast %43 : vector<1x32xf32> to vector<8x32xf32>
    %45 = arith.addf %42, %44 : vector<8x32xf32>
    %46 = vector.extract_strided_slice %37 {offsets = [0, 0], sizes = [8, 8], strides = [1, 1]} : vector<8x32xbf16> to vector<8x8xbf16>
    %47 = vector.extract_strided_slice %39 {offsets = [0, 0], sizes = [8, 8], strides = [1, 1]} : vector<8x32xbf16> to vector<8x8xbf16>
    %cst_22 = arith.constant dense<0.000000e+00> : vector<8x8xf32>
    %48 = tpu.matmul %46, %47, %cst_22 {dimension_numbers = #tpu.dot_dimension_numbers<[1], [1], [0], [0], [0, 0, 1, 0], [], []>} : vector<8x8xbf16>, vector<8x8xbf16>, vector<8x8xf32> -> vector<8x8xf32>
    %49 = arith.addf %48, %4 : vector<8x8xf32>
    %cst_23 = arith.constant dense<0xFF800000> : vector<8xf32>
    %50 = vector.multi_reduction <maximumf>, %49, %cst_23 [1] : vector<8x8xf32> to vector<8xf32>
    %51 = vector.shape_cast %50 : vector<8xf32> to vector<8x1xf32>
    %52 = vector.broadcast %51 : vector<8x1xf32> to vector<8x8xf32>
    %53 = arith.subf %49, %52 : vector<8x8xf32>
    %54 = math.exp %53 : vector<8x8xf32>
    %cst_24 = arith.constant dense<0.000000e+00> : vector<8xf32>
    %55 = vector.multi_reduction <add>, %54, %cst_24 [1] : vector<8x8xf32> to vector<8xf32>
    %56 = vector.shape_cast %55 : vector<8xf32> to vector<8x1xf32>
    %57 = tpu.reciprocal %56 {approx = true} : vector<8x1xf32> -> vector<8x1xf32>
    %58 = vector.broadcast %57 : vector<8x1xf32> to vector<8x8xf32>
    %59 = arith.mulf %54, %58 : vector<8x8xf32>
    %60 = arith.truncf %59 : vector<8x8xf32> to vector<8x8xbf16>
    %61 = vector.extract_strided_slice %41 {offsets = [0, 0], sizes = [8, 8], strides = [1, 1]} : vector<8x32xbf16> to vector<8x8xbf16>
    %cst_25 = arith.constant dense<0.000000e+00> : vector<8x8xf32>
    %62 = tpu.matmul %60, %61, %cst_25 {dimension_numbers = #tpu.dot_dimension_numbers<[1], [0], [0], [1], [0, 0, 1, 1], [], []>} : vector<8x8xbf16>, vector<8x8xbf16>, vector<8x8xf32> -> vector<8x8xf32>
    %63 = arith.truncf %62 : vector<8x8xf32> to vector<8x8xbf16>
    %c0_26 = arith.constant 0 : index
    %c0_27 = arith.constant 0 : index
    %64 = vector.load %arg7[%c0_26, %c0_27] : memref<32x32xbf16, #tpu.memory_space<vmem>>, vector<8x32xbf16>
    %cst_28 = arith.constant dense<0.000000e+00> : vector<8x32xf32>
    %65 = tpu.matmul %63, %64, %cst_28 {dimension_numbers = #tpu.dot_dimension_numbers<[1], [0], [0], [1], [0, 0, 1, 1], [], []>} : vector<8x8xbf16>, vector<8x32xbf16>, vector<8x32xf32> -> vector<8x32xf32>
    %66 = arith.addf %45, %65 : vector<8x32xf32>
    %67 = vector.extract_strided_slice %37 {offsets = [0, 8], sizes = [8, 8], strides = [1, 1]} : vector<8x32xbf16> to vector<8x8xbf16>
    %68 = vector.extract_strided_slice %39 {offsets = [0, 8], sizes = [8, 8], strides = [1, 1]} : vector<8x32xbf16> to vector<8x8xbf16>
    %cst_29 = arith.constant dense<0.000000e+00> : vector<8x8xf32>
    %69 = tpu.matmul %67, %68, %cst_29 {dimension_numbers = #tpu.dot_dimension_numbers<[1], [1], [0], [0], [0, 0, 1, 0], [], []>} : vector<8x8xbf16>, vector<8x8xbf16>, vector<8x8xf32> -> vector<8x8xf32>
    %70 = arith.addf %69, %4 : vector<8x8xf32>
    %cst_30 = arith.constant dense<0xFF800000> : vector<8xf32>
    %71 = vector.multi_reduction <maximumf>, %70, %cst_30 [1] : vector<8x8xf32> to vector<8xf32>
    %72 = vector.shape_cast %71 : vector<8xf32> to vector<8x1xf32>
    %73 = vector.broadcast %72 : vector<8x1xf32> to vector<8x8xf32>
    %74 = arith.subf %70, %73 : vector<8x8xf32>
    %75 = math.exp %74 : vector<8x8xf32>
    %cst_31 = arith.constant dense<0.000000e+00> : vector<8xf32>
    %76 = vector.multi_reduction <add>, %75, %cst_31 [1] : vector<8x8xf32> to vector<8xf32>
    %77 = vector.shape_cast %76 : vector<8xf32> to vector<8x1xf32>
    %78 = tpu.reciprocal %77 {approx = true} : vector<8x1xf32> -> vector<8x1xf32>
    %79 = vector.broadcast %78 : vector<8x1xf32> to vector<8x8xf32>
    %80 = arith.mulf %75, %79 : vector<8x8xf32>
    %81 = arith.truncf %80 : vector<8x8xf32> to vector<8x8xbf16>
    %82 = vector.extract_strided_slice %41 {offsets = [0, 8], sizes = [8, 8], strides = [1, 1]} : vector<8x32xbf16> to vector<8x8xbf16>
    %cst_32 = arith.constant dense<0.000000e+00> : vector<8x8xf32>
    %83 = tpu.matmul %81, %82, %cst_32 {dimension_numbers = #tpu.dot_dimension_numbers<[1], [0], [0], [1], [0, 0, 1, 1], [], []>} : vector<8x8xbf16>, vector<8x8xbf16>, vector<8x8xf32> -> vector<8x8xf32>
    %84 = arith.truncf %83 : vector<8x8xf32> to vector<8x8xbf16>
    %c8 = arith.constant 8 : index
    %c0_33 = arith.constant 0 : index
    %85 = vector.load %arg7[%c8, %c0_33] : memref<32x32xbf16, #tpu.memory_space<vmem>>, vector<8x32xbf16>
    %cst_34 = arith.constant dense<0.000000e+00> : vector<8x32xf32>
    %86 = tpu.matmul %84, %85, %cst_34 {dimension_numbers = #tpu.dot_dimension_numbers<[1], [0], [0], [1], [0, 0, 1, 1], [], []>} : vector<8x8xbf16>, vector<8x32xbf16>, vector<8x32xf32> -> vector<8x32xf32>
    %87 = arith.addf %66, %86 : vector<8x32xf32>
    %88 = vector.extract_strided_slice %37 {offsets = [0, 16], sizes = [8, 8], strides = [1, 1]} : vector<8x32xbf16> to vector<8x8xbf16>
    %89 = vector.extract_strided_slice %39 {offsets = [0, 16], sizes = [8, 8], strides = [1, 1]} : vector<8x32xbf16> to vector<8x8xbf16>
    %cst_35 = arith.constant dense<0.000000e+00> : vector<8x8xf32>
    %90 = tpu.matmul %88, %89, %cst_35 {dimension_numbers = #tpu.dot_dimension_numbers<[1], [1], [0], [0], [0, 0, 1, 0], [], []>} : vector<8x8xbf16>, vector<8x8xbf16>, vector<8x8xf32> -> vector<8x8xf32>
    %91 = arith.addf %90, %4 : vector<8x8xf32>
    %cst_36 = arith.constant dense<0xFF800000> : vector<8xf32>
    %92 = vector.multi_reduction <maximumf>, %91, %cst_36 [1] : vector<8x8xf32> to vector<8xf32>
    %93 = vector.shape_cast %92 : vector<8xf32> to vector<8x1xf32>
    %94 = vector.broadcast %93 : vector<8x1xf32> to vector<8x8xf32>
    %95 = arith.subf %91, %94 : vector<8x8xf32>
    %96 = math.exp %95 : vector<8x8xf32>
    %cst_37 = arith.constant dense<0.000000e+00> : vector<8xf32>
    %97 = vector.multi_reduction <add>, %96, %cst_37 [1] : vector<8x8xf32> to vector<8xf32>
    %98 = vector.shape_cast %97 : vector<8xf32> to vector<8x1xf32>
    %99 = tpu.reciprocal %98 {approx = true} : vector<8x1xf32> -> vector<8x1xf32>
    %100 = vector.broadcast %99 : vector<8x1xf32> to vector<8x8xf32>
    %101 = arith.mulf %96, %100 : vector<8x8xf32>
    %102 = arith.truncf %101 : vector<8x8xf32> to vector<8x8xbf16>
    %103 = vector.extract_strided_slice %41 {offsets = [0, 16], sizes = [8, 8], strides = [1, 1]} : vector<8x32xbf16> to vector<8x8xbf16>
    %cst_38 = arith.constant dense<0.000000e+00> : vector<8x8xf32>
    %104 = tpu.matmul %102, %103, %cst_38 {dimension_numbers = #tpu.dot_dimension_numbers<[1], [0], [0], [1], [0, 0, 1, 1], [], []>} : vector<8x8xbf16>, vector<8x8xbf16>, vector<8x8xf32> -> vector<8x8xf32>
    %105 = arith.truncf %104 : vector<8x8xf32> to vector<8x8xbf16>
    %c16 = arith.constant 16 : index
    %c0_39 = arith.constant 0 : index
    %106 = vector.load %arg7[%c16, %c0_39] : memref<32x32xbf16, #tpu.memory_space<vmem>>, vector<8x32xbf16>
    %cst_40 = arith.constant dense<0.000000e+00> : vector<8x32xf32>
    %107 = tpu.matmul %105, %106, %cst_40 {dimension_numbers = #tpu.dot_dimension_numbers<[1], [0], [0], [1], [0, 0, 1, 1], [], []>} : vector<8x8xbf16>, vector<8x32xbf16>, vector<8x32xf32> -> vector<8x32xf32>
    %108 = arith.addf %87, %107 : vector<8x32xf32>
    %109 = vector.extract_strided_slice %37 {offsets = [0, 24], sizes = [8, 8], strides = [1, 1]} : vector<8x32xbf16> to vector<8x8xbf16>
    %110 = vector.extract_strided_slice %39 {offsets = [0, 24], sizes = [8, 8], strides = [1, 1]} : vector<8x32xbf16> to vector<8x8xbf16>
    %cst_41 = arith.constant dense<0.000000e+00> : vector<8x8xf32>
    %111 = tpu.matmul %109, %110, %cst_41 {dimension_numbers = #tpu.dot_dimension_numbers<[1], [1], [0], [0], [0, 0, 1, 0], [], []>} : vector<8x8xbf16>, vector<8x8xbf16>, vector<8x8xf32> -> vector<8x8xf32>
    %112 = arith.addf %111, %4 : vector<8x8xf32>
    %cst_42 = arith.constant dense<0xFF800000> : vector<8xf32>
    %113 = vector.multi_reduction <maximumf>, %112, %cst_42 [1] : vector<8x8xf32> to vector<8xf32>
    %114 = vector.shape_cast %113 : vector<8xf32> to vector<8x1xf32>
    %115 = vector.broadcast %114 : vector<8x1xf32> to vector<8x8xf32>
    %116 = arith.subf %112, %115 : vector<8x8xf32>
    %117 = math.exp %116 : vector<8x8xf32>
    %cst_43 = arith.constant dense<0.000000e+00> : vector<8xf32>
    %118 = vector.multi_reduction <add>, %117, %cst_43 [1] : vector<8x8xf32> to vector<8xf32>
    %119 = vector.shape_cast %118 : vector<8xf32> to vector<8x1xf32>
    %120 = tpu.reciprocal %119 {approx = true} : vector<8x1xf32> -> vector<8x1xf32>
    %121 = vector.broadcast %120 : vector<8x1xf32> to vector<8x8xf32>
    %122 = arith.mulf %117, %121 : vector<8x8xf32>
    %123 = arith.truncf %122 : vector<8x8xf32> to vector<8x8xbf16>
    %124 = vector.extract_strided_slice %41 {offsets = [0, 24], sizes = [8, 8], strides = [1, 1]} : vector<8x32xbf16> to vector<8x8xbf16>
    %cst_44 = arith.constant dense<0.000000e+00> : vector<8x8xf32>
    %125 = tpu.matmul %123, %124, %cst_44 {dimension_numbers = #tpu.dot_dimension_numbers<[1], [0], [0], [1], [0, 0, 1, 1], [], []>} : vector<8x8xbf16>, vector<8x8xbf16>, vector<8x8xf32> -> vector<8x8xf32>
    %126 = arith.truncf %125 : vector<8x8xf32> to vector<8x8xbf16>
    %c24 = arith.constant 24 : index
    %c0_45 = arith.constant 0 : index
    %127 = vector.load %arg7[%c24, %c0_45] : memref<32x32xbf16, #tpu.memory_space<vmem>>, vector<8x32xbf16>
    %cst_46 = arith.constant dense<0.000000e+00> : vector<8x32xf32>
    %128 = tpu.matmul %126, %127, %cst_46 {dimension_numbers = #tpu.dot_dimension_numbers<[1], [0], [0], [1], [0, 0, 1, 1], [], []>} : vector<8x8xbf16>, vector<8x32xbf16>, vector<8x32xf32> -> vector<8x32xf32>
    %129 = arith.addf %108, %128 : vector<8x32xf32>
    %130 = arith.addf %1, %129 : vector<8x32xf32>
    %c0_47 = arith.constant 0 : index
    %c0_48 = arith.constant 0 : index
    %131 = vector.load %arg9[%c0_47, %c0_48] : memref<1x32xf32, #tpu.memory_space<vmem>>, vector<1x32xf32>
    %c0_49 = arith.constant 0 : index
    %c0_50 = arith.constant 0 : index
    %132 = vector.load %arg10[%c0_49, %c0_50] : memref<1x32xf32, #tpu.memory_space<vmem>>, vector<1x32xf32>
    %cst_51 = arith.constant dense<0.000000e+00> : vector<8xf32>
    %133 = vector.multi_reduction <add>, %130, %cst_51 [1] : vector<8x32xf32> to vector<8xf32>
    %134 = vector.shape_cast %133 : vector<8xf32> to vector<8x1xf32>
    %cst_52 = arith.constant 3.200000e+01 : f32
    %135 = vector.broadcast %cst_52 : f32 to vector<8x1xf32>
    %136 = arith.divf %134, %135 : vector<8x1xf32>
    %137 = vector.broadcast %136 : vector<8x1xf32> to vector<8x32xf32>
    %138 = arith.subf %130, %137 : vector<8x32xf32>
    %139 = arith.mulf %138, %138 : vector<8x32xf32>
    %cst_53 = arith.constant dense<0.000000e+00> : vector<8xf32>
    %140 = vector.multi_reduction <add>, %139, %cst_53 [1] : vector<8x32xf32> to vector<8xf32>
    %141 = vector.shape_cast %140 : vector<8xf32> to vector<8x1xf32>
    %cst_54 = arith.constant 0.0322580636 : f32
    %142 = vector.broadcast %cst_54 : f32 to vector<8x1xf32>
    %143 = arith.mulf %141, %142 : vector<8x1xf32>
    %144 = math.sqrt %143 : vector<8x1xf32>
    %cst_55 = arith.constant 9.99999997E-7 : f32
    %145 = vector.broadcast %cst_55 : f32 to vector<8x1xf32>
    %146 = arith.addf %144, %145 : vector<8x1xf32>
    %147 = tpu.reciprocal %146 {approx = true} : vector<8x1xf32> -> vector<8x1xf32>
    %148 = vector.broadcast %131 : vector<1x32xf32> to vector<8x32xf32>
    %149 = arith.mulf %148, %138 : vector<8x32xf32>
    %150 = vector.broadcast %147 : vector<8x1xf32> to vector<8x32xf32>
    %151 = arith.mulf %149, %150 : vector<8x32xf32>
    %152 = vector.broadcast %132 : vector<1x32xf32> to vector<8x32xf32>
    %153 = arith.addf %151, %152 : vector<8x32xf32>
    %154 = arith.truncf %153 : vector<8x32xf32> to vector<8x32xbf16>
    %c0_56 = arith.constant 0 : index
    %c0_57 = arith.constant 0 : index
    %155 = vector.load %arg11[%c0_56, %c0_57] : memref<32x64xbf16, #tpu.memory_space<vmem>>, vector<32x64xbf16>
    %cst_58 = arith.constant dense<0.000000e+00> : vector<8x64xf32>
    %156 = tpu.matmul %154, %155, %cst_58 {dimension_numbers = #tpu.dot_dimension_numbers<[1], [0], [0], [1], [0, 0, 1, 1], [], []>} : vector<8x32xbf16>, vector<32x64xbf16>, vector<8x64xf32> -> vector<8x64xf32>
    %c0_59 = arith.constant 0 : index
    %c0_60 = arith.constant 0 : index
    %157 = vector.load %arg12[%c0_59, %c0_60] : memref<1x64xf32, #tpu.memory_space<vmem>>, vector<1x64xf32>
    %158 = vector.broadcast %157 : vector<1x64xf32> to vector<8x64xf32>
    %159 = arith.addf %156, %158 : vector<8x64xf32>
    %cst_61 = arith.constant 0.000000e+00 : f32
    %160 = vector.broadcast %cst_61 : f32 to vector<8x64xf32>
    %161 = arith.maximumf %159, %160 : vector<8x64xf32>
    %162 = arith.truncf %161 : vector<8x64xf32> to vector<8x64xbf16>
    %c0_62 = arith.constant 0 : index
    %c0_63 = arith.constant 0 : index
    %163 = vector.load %arg13[%c0_62, %c0_63] : memref<64x32xbf16, #tpu.memory_space<vmem>>, vector<64x32xbf16>
    %cst_64 = arith.constant dense<0.000000e+00> : vector<8x32xf32>
    %164 = tpu.matmul %162, %163, %cst_64 {dimension_numbers = #tpu.dot_dimension_numbers<[1], [0], [0], [1], [0, 0, 1, 1], [], []>} : vector<8x64xbf16>, vector<64x32xbf16>, vector<8x32xf32> -> vector<8x32xf32>
    %c0_65 = arith.constant 0 : index
    %c0_66 = arith.constant 0 : index
    %165 = vector.load %arg14[%c0_65, %c0_66] : memref<1x32xf32, #tpu.memory_space<vmem>>, vector<1x32xf32>
    %166 = vector.broadcast %165 : vector<1x32xf32> to vector<8x32xf32>
    %167 = arith.addf %164, %166 : vector<8x32xf32>
    %168 = arith.addf %130, %167 : vector<8x32xf32>
    %c0_67 = arith.constant 0 : index
    %c0_68 = arith.constant 0 : index
    %c0_69 = arith.constant 0 : index
    %169 = vector.load %arg15[%c0_67, %c0_68, %c0_69] : memref<1x8x32xf32, #tpu.memory_space<vmem>>, vector<1x8x32xf32>
    %170 = vector.shape_cast %169 : vector<1x8x32xf32> to vector<8x32xf32>
    %171 = vector.shape_cast %168 : vector<8x32xf32> to vector<1x8x32xf32>
    tpu.vector_store %arg15[%c0_67, %c0_68, %c0_69], %171 {strides = array<i32>} : memref<1x8x32xf32, #tpu.memory_space<vmem>>, vector<1x8x32xf32>,
    return
  }
  func.func @transform_0(%arg0: i32) -> (i32, i32, i32) {
    %c0_i32 = arith.constant 0 : i32
    %c0_i32_0 = arith.constant 0 : i32
    %c0_i32_1 = arith.constant 0 : i32
    return %arg0, %c0_i32, %c0_i32_0 : i32, i32, i32
  }
  func.func @transform_1(%arg0: i32) -> (i32, i32, i32) {
    %c0_i32 = arith.constant 0 : i32
    %c0_i32_0 = arith.constant 0 : i32
    %c0_i32_1 = arith.constant 0 : i32
    %c0_i32_2 = arith.constant 0 : i32
    return %c0_i32, %c0_i32_0, %c0_i32_1 : i32, i32, i32
  }
  func.func @transform_2(%arg0: i32) -> (i32, i32) {
    %c0_i32 = arith.constant 0 : i32
    %c0_i32_0 = arith.constant 0 : i32
    %c0_i32_1 = arith.constant 0 : i32
    return %c0_i32, %c0_i32_0 : i32, i32
  }
  func.func @transform_3(%arg0: i32) -> (i32, i32) {
    %c0_i32 = arith.constant 0 : i32
    %c0_i32_0 = arith.constant 0 : i32
    %c0_i32_1 = arith.constant 0 : i32
    return %c0_i32, %c0_i32_0 : i32, i32
  }
  func.func @transform_4(%arg0: i32) -> (i32, i32) {
    %c0_i32 = arith.constant 0 : i32
    %c0_i32_0 = arith.constant 0 : i32
    %c0_i32_1 = arith.constant 0 : i32
    return %c0_i32, %c0_i32_0 : i32, i32
  }
  func.func @transform_5(%arg0: i32) -> (i32, i32) {
    %c0_i32 = arith.constant 0 : i32
    %c0_i32_0 = arith.constant 0 : i32
    %c0_i32_1 = arith.constant 0 : i32
    return %c0_i32, %c0_i32_0 : i32, i32
  }
  func.func @transform_6(%arg0: i32) -> (i32, i32) {
    %c0_i32 = arith.constant 0 : i32
    %c0_i32_0 = arith.constant 0 : i32
    %c0_i32_1 = arith.constant 0 : i32
    return %c0_i32, %c0_i32_0 : i32, i32
  }
  func.func @transform_7(%arg0: i32) -> (i32, i32) {
    %c0_i32 = arith.constant 0 : i32
    %c0_i32_0 = arith.constant 0 : i32
    %c0_i32_1 = arith.constant 0 : i32
    return %c0_i32, %c0_i32_0 : i32, i32
  }
  func.func @transform_8(%arg0: i32) -> (i32, i32) {
    %c0_i32 = arith.constant 0 : i32
    %c0_i32_0 = arith.constant 0 : i32
    %c0_i32_1 = arith.constant 0 : i32
    return %c0_i32, %c0_i32_0 : i32, i32
  }
  func.func @transform_9(%arg0: i32) -> (i32, i32) {
    %c0_i32 = arith.constant 0 : i32
    %c0_i32_0 = arith.constant 0 : i32
    %c0_i32_1 = arith.constant 0 : i32
    return %c0_i32, %c0_i32_0 : i32, i32
  }
  func.func @transform_10(%arg0: i32) -> (i32, i32) {
    %c0_i32 = arith.constant 0 : i32
    %c0_i32_0 = arith.constant 0 : i32
    %c0_i32_1 = arith.constant 0 : i32
    return %c0_i32, %c0_i32_0 : i32, i32
  }
  func.func @transform_11(%arg0: i32) -> (i32, i32) {
    %c0_i32 = arith.constant 0 : i32
    %c0_i32_0 = arith.constant 0 : i32
    %c0_i32_1 = arith.constant 0 : i32
    return %c0_i32, %c0_i32_0 : i32, i32
  }
  func.func @transform_12(%arg0: i32) -> (i32, i32) {
    %c0_i32 = arith.constant 0 : i32
    %c0_i32_0 = arith.constant 0 : i32
    %c0_i32_1 = arith.constant 0 : i32
    return %c0_i32, %c0_i32_0 : i32, i32
  }
  func.func @transform_13(%arg0: i32) -> (i32, i32) {
    %c0_i32 = arith.constant 0 : i32
    %c0_i32_0 = arith.constant 0 : i32
    %c0_i32_1 = arith.constant 0 : i32
    return %c0_i32, %c0_i32_0 : i32, i32
  }
  func.func @transform_14(%arg0: i32) -> (i32, i32, i32) {
    %c0_i32 = arith.constant 0 : i32
    %c0_i32_0 = arith.constant 0 : i32
    %c0_i32_1 = arith.constant 0 : i32
    return %arg0, %c0_i32, %c0_i32_0 : i32, i32, i32
  }
}

</mosaic_0001>

<bundles_post_ra>
// kernel: decoder_layer_forward.1
= control target key start
LH: loop header
LB: loop body
LE: loop exit
PB: predicated region body
PF: predicated region fallthrough
CT: control target
= control target key end

     0   :  { %19 = vsyncpa [#allocation3], 0  ;;  %s2202_s0 = inlined_call_operand.vmem [shape: f32[2,8,32], index: 0, kind: input, shape index: {}]   ;;  %s2203_s1 = inlined_call_operand.vmem [shape: bf16[1,8,8], index: 1, kind: input, shape index: {}]   ;;  %s2204_s2 = inlined_call_operand.vmem [shape: f32[1,32], index: 2, kind: input, shape index: {}]   ;;  %s2205_s3 = inlined_call_operand.vmem [shape: f32[1,32], index: 3, kind: input, shape index: {}]   ;;  %s2206_s4 = inlined_call_operand.vmem [shape: bf16[32,96], index: 4, kind: input, shape index: {}]   ;;  %s2207_s5 = inlined_call_operand.vmem [shape: f32[1,96], index: 5, kind: input, shape index: {}]   ;;  %s2208_s6 = inlined_call_operand.vmem [shape: bf16[32,32], index: 6, kind: input, shape index: {}]   ;;  %s2209_s7 = inlined_call_operand.vmem [shape: f32[1,32], index: 7, kind: input, shape index: {}]   ;;  %s2210_s8 = inlined_call_operand.hbm [shape: f32[1,32], index: 8, kind: input, shape index: {}]   ;;  %s2211_s9 = inlined_call_operand.hbm [shape: f32[1,32], index: 9, kind: input, shape index: {}]   ;;  %s2212_s10 = inlined_call_operand.vmem [shape: bf16[32,64], index: 10, kind: input, shape index: {}]   ;;  %s2213_s11 = inlined_call_operand.vmem [shape: f32[1,64], index: 11, kind: input, shape index: {}]   ;;  %s2214_s12 = inlined_call_operand.vmem [shape: bf16[64,32], index: 12, kind: input, shape index: {}]   ;;  %s2215_s13 = inlined_call_operand.vmem [shape: f32[1,32], index: 13, kind: input, shape index: {}]   ;;  %s2216_s14 = inlined_call_operand.vmem [shape: f32[2,8,32], index: 14, kind: output, shape index: {}]  }
   0x1   :  { %20 = vsyncpa [#allocation5], 0  ;;  %s1928_s29 = smov 0  }
   0x2 LB: > { %s1934_s30 = sadd.s32 4294967295, %s1836_s29   ;;  %p1515_p0 = scmp.ge.s32.totalorder %s1836_s29, 1  ;;  %s1836_s29 = sphi %s1928_s29, %s26_s29  }
   0x3   : > { %p356_p1 = scmp.lt.s32.totalorder %s1836_s29, 3  ;;  %p2217_p2 = scmp.eq.s32.totalorder %s1934_s30, 0 }
   0x4   : > { %s1838_s16 = smov [#allocation2]   ;;  %s1839_s18 = smov [#allocation4]  }
   0x5   : > { %p1939_p3 = pnand %p1515_p0, %p356_p1  ;;  %s390_s17 = sshll.u32 %s1838_s16, 4  ;;  %s391_s17 = int_to_ptr.vmem [resolvable:$true] %s390_s17 }
   0x6   : > { %s401_s19 = sshll.u32 %s1839_s18, 4  ;;  %s1766_s23 = scalar_lea.hbm %s2210_s8, 16  ;;  %s1951_s19 = int_to_ptr.vmem [resolvable:$true] %s401_s19 }
   0x7   : > { %s2219_s15 = scalar_select %p1939_p3, 1, 0 }
   0x8   : > { %p1700_p4 = pneg %p1939_p3  ;;  %p1767_p6 = scmp.ne.s32.totalorder %s2210_s8, %s1766_s23 }
   0x9   : > { %p1773_p10 = scmp.lt.u32.totalorder %s1766_s23, %s2210_s8 }
   0xa   : > { %p1947_p5 = pnand %p2217_p2, %p1700_p4 }
   0xc   : > { %p1768_p7 = pneg %p1947_p5 }
   0xe   : > { %p1769_p8 = pnand %p1768_p7, %p1767_p6 }
  0x10   : > { %p1770_p9 = pneg %p1769_p8 }
  0x12   : > { %p1775_p11 = pnand %p1773_p10, %p1770_p9 }
  0x14   : > { %1778 = shalt.err (!%p1775_p11)
}
  0x15   : > { %s1779_s28 = scalar_lea.vmem %s391_s17, 16  ;;  %s1786_s16 = scalar_lea.vmem %s391_s17, 32 }
  0x16   : > { %p1780_p12 = scmp.ne.s32.totalorder %s391_s17, %s1779_s28  ;;  %p1787_p1 = scmp.lt.s32.totalorder %s391_s17, %s391_s17 }
  0x17   : > { %p1788_p4 = scmp.lt.s32.totalorder %s1786_s16, %s1779_s28 }
  0x18   : > { %p1782_p13 = pnand %p1780_p12, %p1768_p7 }
  0x19   : > { %p1789_p2 = por %p1788_p4, %p1787_p1 }
  0x1a   : > { %p1783_p0 = pneg %p1782_p13 }
  0x1c   : > { %p1790_p3 = pnand %p1789_p2, %p1783_p0 }
  0x1e   : > { %1793 = shalt.err (!%p1790_p3)
}
  0x1f   : > { %1703 = dma.hbm_to_vmem [thread:$0]  (!%p1947_p5), %s2210_s8, 16, %s391_s17, [#allocation3]  }
  0x20   : > { %s1794_s24 = scalar_lea.hbm %s2211_s9, 16 }
  0x21   : > { %p1795_p6 = scmp.ne.s32.totalorder %s2211_s9, %s1794_s24  ;;  %p1801_p3 = scmp.lt.u32.totalorder %s1794_s24, %s2211_s9 }
  0x23   : > { %p1797_p8 = pnand %p1795_p6, %p1768_p7 }
  0x25   : > { %p1798_p2 = pneg %p1797_p8 }
  0x27   : > { %p1803_p9 = pnand %p1801_p3, %p1798_p2 }
  0x29   : > { %1806 = shalt.err (!%p1803_p9)
}
  0x2a   : > { %s1807_s17 = scalar_lea.vmem %s1951_s19, 16  ;;  %s1814_s16 = scalar_lea.vmem %s1951_s19, 32 }
  0x2b   : > { %p1808_p10 = scmp.ne.s32.totalorder %s1951_s19, %s1807_s17  ;;  %p1815_p13 = scmp.lt.s32.totalorder %s1951_s19, %s1951_s19 }
  0x2c   : > { %p1816_p0 = scmp.lt.s32.totalorder %s1814_s16, %s1807_s17 }
  0x2d   : > { %p1810_p11 = pnand %p1808_p10, %p1768_p7 }
  0x2e   : > { %p1817_p1 = por %p1816_p0, %p1815_p13 }
  0x2f   : > { %p1811_p12 = pneg %p1810_p11 }
  0x31   : > { %p1818_p4 = pnand %p1817_p1, %p1811_p12 }
  0x33   : > { %1821 = shalt.err (!%p1818_p4)
}
  0x34   : > { %1706 = dma.hbm_to_vmem [thread:$0]  (!%p1947_p5), %s2211_s9, 16, %s1951_s19, [#allocation5]  }
  0x35   : > { %p2221_p6 = scmp.ne.s32.totalorder %s2219_s15, 0 }
  0x36   : > { %p2222_p7 = scmp.eq.s32.totalorder (!%p2221_p6), %s1934_s30, 0 }
  0x37   : > { %433 = sbr.rel (%p2221_p6) target bundleno = 4076 (0xfec), region = 76 }
  0x3e   : > { %1827 = dma.done.wait (%p2222_p7), [#allocation3], 16   ;;  %p2223_p8 = pmov %p2222_p7 }
  0x3f   : > { %p2224_p2 = pmov %p2222_p7 }
  0x40   : > { %1829 = vsyncadd (%p2223_p8), [#allocation3], 4294967280 }
  0x41   : > { %1831 = dma.done.wait (%p2224_p2), [#allocation5], 16   ;;  %p2225_p3 = pmov %p2224_p2 }
  0x42   : > { %p481_p9 = scmp.lt.s32.totalorder %s1934_s30, 1  ;;  %vm495_vm0 = vcmask 261120   ;;  %v1734_v7 = vld [vmem:[%s2206_s4] sm:$0xff]   ;;  %v1840_v8 = vmov 0.0   ;;  %vm1841_vm1 = vmmov 0   ;;  %v1735_v9 = vld [vmem:[%s2206_s4 + $0x8] sm:$0xff]  }
  0x43   : > { %1833 = vsyncadd (%p2225_p3), [#allocation5], 4294967280  ;;  %1592 = vmatprep.subr.bf16.mxu1 %v1840_v8  ;;  %1596 = vmatprep.mubr.msk.bf16.mxu1 %vm1841_vm1, %v1840_v8  ;;  %v1524_v18 = vld [vmem:[%s2204_s2] ss:$0 sm:$0xff]  ;;  %s1842_s19 = smov 64   ;;  %s1843_s20 = smov 96  }
  0x44   : > { %s2227_s30 = smov (!%p481_p9, %s1934_s30), 1  ;;  %1593 = vmatpush3.bf16.msra.mxu1 %v1734_v7  ;;  %1606 = vmatprep.subr.bf16.mxu0 %v1840_v8  ;;  %v1525_v21 = vld [vmem:[%s2205_s3] ss:$0 sm:$0xff]  ;;  %vm612_vm4 = vcmask 64512   ;;  %vm676_vm5 = vcmask 1043456   ;;  %s1844_s24 = smov 88  }
  0x45   : > { %s1522_s15 = sshll.u32 %s2227_s30, 3  ;;  %1594 = vmatprep.subr.bf16.mxu1 %v1840_v8  ;;  %1608 = vmatprep.mubr.msk.bf16.mxu0 %vm1841_vm1, %v1840_v8  ;;  %v1526_v25 = vld [vmem:[%s2207_s5] ss:$0 sm:$0xff]  ;;  %s1845_s25 = smov 120   ;;  %vm1392_vm8 = vcmask 523264  }
  0x46   : > { %s484_s22 = scalar_lea.vmem %s2202_s0, %s1522_s15  ;;  %v491_v38 = vld [vmem:[%s2203_s1] sm:$0xf]  ;;  %s1846_s28 = smov 56  }
  0x47   : > { %v2021_v0 = vld [vmem:[%s484_s22] sm:$0xff]  ;;  %v2070_v39 = vunpack.c.l.bf16 %v491_v38  ;;  %s1847_s17 = smov 80   ;;  %s1848_s16 = smov 112  }
  0x48   : > { %v496_v1 = vsel %vm495_vm0, %v2021_v0, 0.0  ;;  %1595 = vmatpush3.bf16.msra.mxu1 %v1735_v9  ;;  %v721_v58 = vld [vmem:[%s2208_s6] sm:$0xf]  ;;  %s1849_s18 = smov 48   ;;  %s1851_s22 = smov 104  }
  0x49   : > { %497 = vadd.xlane.f32.xlu0 %v496_v1  ;;  %1600 = vmatprep.subr.bf16.mxu1 %v1840_v8  ;;  %v726_v59 = vsel %vm676_vm5, %v721_v58, 0  ;;  %s1852_s27 = smov 40  }
  0xd6   : > { %v498_v2 = vpop.xlane.xlu0 %497 }
  0xd7   : > { %v500_v3 = vmul.f32 0.03125, %v498_v2 }
  0xd9   : > { %v501_v4 = vsub.f32 %v2021_v0, %v500_v3 }
  0xdb   : > { %v502_v5 = vmul.f32 %v501_v4, %v501_v4  ;;  %v522_v19 = vmul.f32 %v1524_v18, %v501_v4 }
  0xdd   : > { %v503_v6 = vsel %vm495_vm0, %v502_v5, 0.0 }
  0xde   : > { %504 = vadd.xlane.f32.xlu0 %v503_v6 }
 0x16b   : > { %v505_v10 = vpop.xlane.xlu0 %504 }
 0x16c   : > { %v506_v11 = vmul.f32 0.032258064, %v505_v10 }
 0x16e   : > { %1742 = vrsqrt.f32 %v506_v11  ;;  %vm509_vm2 = vcmp.eq.f32.partialorder %v506_v11, inf  ;;  %v512_v14 = vand.u32 2147483648, %v506_v11  ;;  %vm511_vm3 = vcmp.eq.f32.partialorder %v506_v11, 0.0 }
 0x178   : > { %v1743_v12 = vpop.eup %1742 }
 0x179   : > { %v508_v13 = vmul.f32 %v1743_v12, %v506_v11 }
 0x17b   : > { %v510_v15 = vsel %vm509_vm2, %v506_v11, %v508_v13 }
 0x17c   : > { %v513_v16 = vsel %vm511_vm3, %v512_v14, %v510_v15 }
 0x17d   : > { %v514_v17 = vadd.f32 1e-06, %v513_v16  ;;  %v881_v16 = vld [vmem:[%s2208_s6 + $0x4] sm:$0xf] }
 0x17f   : > { %1744 = vrcp.f32 %v514_v17  ;;  %v886_v17 = vsel %vm676_vm5, %v881_v16, 0 }
 0x189   : > { %v1745_v20 = vpop.eup %1744 }
 0x18a   : > { %v523_v22 = vmul.f32 %v1745_v20, %v522_v19 }
 0x18c   : > { %v530_v23 = vadd.f32 %v1525_v21, %v523_v22 }
 0x18e   : > { %v531_v24 = vpack.c.bf16 %v530_v23, %v530_v23 }
 0x190   : > { %1597 = vmatmul.mubr.msk.bf16.vlgmr.msra.gmra.mrb[0].mxu1 %vm495_vm0, %v531_v24 }
 0x191   : > { %1602 = vmatprep.mubr.msk.bf16.mxu1 %vm1841_vm1, %v1840_v8 }
 0x263   : > { %v592_v26 = vpop.f32.mrb[0].mxu1 }
 0x264   : > { %v593_v27 = vadd.f32 %v1526_v25, %v592_v26  ;;  %v1598_v28 = vpop.f32.mrb[1].mxu1 }
 0x265   : > { %v595_v29 = vpop.f32.mrb[2].mxu1 }
 0x266   : > { %v2053_v30 = vpack.c.bf16 %v593_v27, %v593_v27  ;;  %v1599_v31 = vpop.f32.mrb[3].mxu1  ;;  %v598_v36 = vmul.f32 0.35355338, %v593_v27 }
 0x268   : > { %671 = vrot.lane.b32.xlu0 %v2053_v30, %s1842_s19  ;;  %610 = vrot.lane.b32.xlu1 %v2053_v30, %s1843_s20  ;;  %v2061_v37 = vpack.c.bf16 %v598_v36, %v598_v36  ;;  %s1850_s20 = smov 72  }
 0x2da   : > { %v672_v32 = vpop.permute.xlu0 %671  ;;  %v611_v33 = vpop.permute.xlu1 %610 }
 0x2db   : > { %v617_v34 = vsel %vm612_vm4, %v611_v33, 0  ;;  %v678_v35 = vsel %vm676_vm5, %v672_v32, 0 }
 0x2dc   : > { %1601 = vmatpush3.bf16.xpose.msra.mxu1 %v617_v34  ;;  %1607 = vmatpush3.bf16.msra.mxu0 %v678_v35 }
 0x2dd   : > { %1618 = vmatprep.subr.bf16.mxu0 %v1840_v8  ;;  %1612 = vmatprep.subr.bf16.mxu1 %v1840_v8 }
 0x2e3   : > { %1603 = vmatmul.mubr.msk.bf16.vlgmr.msra.gmra.mrb[4].mxu1 %vm612_vm4, %v2061_v37 }
 0x2e4   : > { %1614 = vmatprep.mubr.msk.bf16.mxu1 %vm1841_vm1, %v1840_v8  ;;  %1613 = vmatpush3.bf16.msra.mxu1 %v726_v59 }
 0x2e5   : > { %1624 = vmatprep.subr.bf16.mxu1 %v1840_v8 }
 0x3b6   : > { %v653_v40 = vpop.f32.mrb[4].mxu1 }
 0x3b7   : > { %v654_v41 = vadd.f32 %v653_v40, %v2070_v39  ;;  %v1604_v42 = vpop.f32.mrb[5].mxu1 }
 0x3b8   : > { %v656_v43 = vpop.f32.mrb[6].mxu1 }
 0x3b9   : > { %v1605_v44 = vpop.f32.mrb[7].mxu1  ;;  %v659_v45 = vsel %vm612_vm4, %v654_v41, -inf }
 0x3ba   : > { %660 = vmax.xlane.f32.xlu1 %v659_v45 }
 0x447   : > { %v661_v46 = vpop.xlane.xlu1 %660 }
 0x448   : > { %v662_v47 = vsub.f32 %v654_v41, %v661_v46 }
 0x44a   : > { %v663_v48 = vmul.f32 1.442695, %v662_v47 }
 0x44c   : > { %1746 = vpow2.f32 %v663_v48 }
 0x456   : > { %v1747_v49 = vpop.eup %1746 }
 0x457   : > { %v665_v50 = vsel %vm612_vm4, %v1747_v49, 0.0 }
 0x458   : > { %666 = vadd.xlane.f32.xlu0 %v665_v50  ;;  %v1530_v50 = vld [vmem:[%s2209_s7] ss:$0 sm:$0xff] }
 0x46e   : > { %772 = vrot.lane.b32.xlu0 %v2053_v30, %s1844_s24 }
 0x472   : > { %770 = vrot.lane.b32.xlu0 %v2061_v37, %s1845_s25 }
 0x4e5   : > { %v667_v51 = vpop.xlane.xlu0 %666 }
 0x4e6   : > { %1748 = vrcp.f32 %v667_v51 }
 0x4e9   : > { %v773_v54 = vpop.permute.xlu0 %772 }
 0x4ea   : > { %v778_v56 = vsel %vm612_vm4, %v773_v54, 0 }
 0x4ed   : > { %v771_v57 = vpop.permute.xlu0 %770 }
 0x4f0   : > { %v1749_v52 = vpop.eup %1748 }
 0x4f1   : > { %v669_v53 = vmul.f32 %v1749_v52, %v1747_v49 }
 0x4f3   : > { %v670_v55 = vpack.c.bf16 %v669_v53, %v669_v53 }
 0x4f5   : > { %1609 = vmatmul.mubr.msk.bf16.vlgmr.msra.gmra.mrb[0].mxu0 %vm612_vm4, %v670_v55 }
 0x4f6   : > { %1619 = vmatpush3.bf16.xpose.msra.mxu0 %v778_v56  ;;  %1620 = vmatprep.mubr.msk.bf16.mxu0 %vm1841_vm1, %v1840_v8 }
 0x4f7   : > { %1630 = vmatprep.subr.bf16.mxu0 %v1840_v8 }
 0x4fd   : > { %1621 = vmatmul.mubr.msk.bf16.vlgmr.msra.gmra.mrb[4].mxu0 %vm612_vm4, %v771_v57 }
 0x4fe   : > { %1632 = vmatprep.mubr.msk.bf16.mxu0 %vm1841_vm1, %v1840_v8  ;;  %1631 = vmatpush3.bf16.msra.mxu0 %v886_v17 }
 0x4ff   : > { %1642 = vmatprep.subr.bf16.mxu0 %v1840_v8 }
 0x5c8   : > { %v714_v60 = vpop.f32.mrb[0].mxu0 }
 0x5c9   : > { %v720_v61 = vpack.c.bf16 %v714_v60, %v714_v60  ;;  %v1610_v62 = vpop.f32.mrb[1].mxu0 }
 0x5ca   : > { %v717_v63 = vpop.f32.mrb[2].mxu0 }
 0x5cb   : > { %v1611_v1 = vpop.f32.mrb[3].mxu0  ;;  %1615 = vmatmul.mubr.msk.bf16.vlgmr.msra.gmra.mrb[8].mxu1 %vm612_vm4, %v720_v61  ;;  %v1040_v63 = vld [vmem:[%s2208_s6 + $0x8] sm:$0xf] }
 0x5cc   : > { %1626 = vmatprep.mubr.msk.bf16.mxu1 %vm1841_vm1, %v1840_v8  ;;  %v1045_v1 = vsel %vm676_vm5, %v1040_v63, 0  ;;  %v1544_v63 = vld [vmem:[#allocation4] ss:$0 sm:$0xff] }
 0x5d0   : > { %v814_v2 = vpop.f32.mrb[4].mxu0 }
 0x5d1   : > { %v815_v3 = vadd.f32 %v814_v2, %v2070_v39  ;;  %v1622_v4 = vpop.f32.mrb[5].mxu0 }
 0x5d2   : > { %v817_v5 = vpop.f32.mrb[6].mxu0 }
 0x5d3   : > { %v1623_v6 = vpop.f32.mrb[7].mxu0  ;;  %v820_v7 = vsel %vm612_vm4, %v815_v3, -inf }
 0x5d4   : > { %821 = vmax.xlane.f32.xlu1 %v820_v7 }
 0x5e5   : > { %832 = vrot.lane.b32.xlu1 %v2053_v30, %s1846_s28 }
 0x5e9   : > { %931 = vrot.lane.b32.xlu1 %v2053_v30, %s1847_s17 }
 0x5ed   : > { %929 = vrot.lane.b32.xlu1 %v2061_v37, %s1848_s16 }
 0x661   : > { %v822_v9 = vpop.xlane.xlu1 %821 }
 0x662   : > { %v823_v10 = vsub.f32 %v815_v3, %v822_v9 }
 0x664   : > { %v824_v11 = vmul.f32 1.442695, %v823_v10 }
 0x665   : > { %v833_v12 = vpop.permute.xlu1 %832 }
 0x666   : > { %1750 = vpow2.f32 %v824_v11  ;;  %v838_v13 = vsel %vm676_vm5, %v833_v12, 0 }
 0x667   : > { %1625 = vmatpush3.bf16.msra.mxu1 %v838_v13 }
 0x668   : > { %1636 = vmatprep.subr.bf16.mxu1 %v1840_v8 }
 0x669   : > { %v932_v25 = vpop.permute.xlu1 %931 }
 0x66a   : > { %v937_v27 = vsel %vm612_vm4, %v932_v25, 0 }
 0x66d   : > { %v930_v28 = vpop.permute.xlu1 %929 }
 0x670   : > { %v1751_v14 = vpop.eup %1750 }
 0x671   : > { %v826_v15 = vsel %vm612_vm4, %v1751_v14, 0.0 }
 0x672   : > { %827 = vadd.xlane.f32.xlu0 %v826_v15 }
 0x688   : > { %991 = vrot.lane.b32.xlu0 %v2053_v30, %s1849_s18 }
 0x69e   : > { %v762_v18 = vpop.f32.mrb[8].mxu1 }
 0x69f   : > { %v1616_v19 = vpop.f32.mrb[9].mxu1  ;;  %v768_v51 = vadd.f32 %v1530_v50, %v762_v18  ;;  %v1736_v50 = vld [vmem:[%s2212_s10] sm:$0xff]  }
 0x6a0   : > { %v765_v20 = vpop.f32.mrb[10].mxu1 }
 0x6a1   : > { %v1617_v21 = vpop.f32.mrb[11].mxu1  ;;  %v1199_v20 = vld [vmem:[%s2208_s6 + $0xc] sm:$0xf] }
 0x6ff   : > { %v828_v22 = vpop.xlane.xlu0 %827 }
 0x700   : > { %1752 = vrcp.f32 %v828_v22 }
 0x703   : > { %v992_v29 = vpop.permute.xlu0 %991 }
 0x704   : > { %v997_v35 = vsel %vm676_vm5, %v992_v29, 0 }
 0x70a   : > { %v1753_v23 = vpop.eup %1752 }
 0x70b   : > { %v830_v24 = vmul.f32 %v1753_v23, %v1751_v14 }
 0x70d   : > { %v831_v26 = vpack.c.bf16 %v830_v24, %v830_v24 }
 0x70f   : > { %1627 = vmatmul.mubr.msk.bf16.vlgmr.msra.gmra.mrb[12].mxu1 %vm612_vm4, %v831_v26 }
 0x710   : > { %1637 = vmatpush3.bf16.xpose.msra.mxu1 %v937_v27  ;;  %1638 = vmatprep.mubr.msk.bf16.mxu1 %vm1841_vm1, %v1840_v8 }
 0x711   : > { %1648 = vmatprep.subr.bf16.mxu1 %v1840_v8 }
 0x717   : > { %1639 = vmatmul.mubr.msk.bf16.vlgmr.msra.gmra.mrb[16].mxu1 %vm612_vm4, %v930_v28 }
 0x718   : > { %1650 = vmatprep.mubr.msk.bf16.mxu1 %vm1841_vm1, %v1840_v8  ;;  %1649 = vmatpush3.bf16.msra.mxu1 %v1045_v1 }
 0x719   : > { %1660 = vmatprep.subr.bf16.mxu1 %v1840_v8 }
 0x7e2   : > { %v874_v31 = vpop.f32.mrb[12].mxu1 }
 0x7e3   : > { %v880_v32 = vpack.c.bf16 %v874_v31, %v874_v31  ;;  %v1628_v33 = vpop.f32.mrb[13].mxu1 }
 0x7e4   : > { %v877_v34 = vpop.f32.mrb[14].mxu1 }
 0x7e5   : > { %v1629_v36 = vpop.f32.mrb[15].mxu1  ;;  %1633 = vmatmul.mubr.msk.bf16.vlgmr.msra.gmra.mrb[8].mxu0 %vm612_vm4, %v880_v32 }
 0x7e6   : > { %1643 = vmatpush3.bf16.msra.mxu0 %v997_v35  ;;  %1644 = vmatprep.mubr.msk.bf16.mxu0 %vm1841_vm1, %v1840_v8 }
 0x7e7   : > { %1654 = vmatprep.subr.bf16.mxu0 %v1840_v8 }
 0x7ea   : > { %v973_v38 = vpop.f32.mrb[16].mxu1 }
 0x7eb   : > { %v974_v40 = vadd.f32 %v973_v38, %v2070_v39  ;;  %v1640_v41 = vpop.f32.mrb[17].mxu1 }
 0x7ec   : > { %v976_v42 = vpop.f32.mrb[18].mxu1 }
 0x7ed   : > { %v1641_v43 = vpop.f32.mrb[19].mxu1  ;;  %v979_v44 = vsel %vm612_vm4, %v974_v40, -inf }
 0x7ee   : > { %980 = vmax.xlane.f32.xlu1 %v979_v44 }
 0x87b   : > { %v981_v45 = vpop.xlane.xlu1 %980 }
 0x87c   : > { %v982_v46 = vsub.f32 %v974_v40, %v981_v45 }
 0x87e   : > { %v983_v47 = vmul.f32 1.442695, %v982_v46 }
 0x880   : > { %1754 = vpow2.f32 %v983_v47 }
 0x88a   : > { %v1755_v48 = vpop.eup %1754 }
 0x88b   : > { %v985_v49 = vsel %vm612_vm4, %v1755_v48, 0.0 }
 0x88c   : > { %986 = vadd.xlane.f32.xlu0 %v985_v49 }
 0x8a2   : > { %1090 = vrot.lane.b32.xlu0 %v2053_v30, %s1850_s20 }
 0x8a6   : > { %1088 = vrot.lane.b32.xlu0 %v2061_v37, %s1851_s22  ;;  %s488_s22 = scalar_lea.vmem %s2216_s14, %s1522_s15 }
 0x8b8   : > { %v922_v52 = vpop.f32.mrb[8].mxu0 }
 0x8b9   : > { %v928_v53 = vadd.f32 %v922_v52, %v768_v51  ;;  %v1634_v54 = vpop.f32.mrb[9].mxu0  ;;  %v1738_v51 = vld [vmem:[%s2214_s12] sm:$0xff]   ;;  %v1739_v52 = vld [vmem:[%s2214_s12 + $0x8] sm:$0xff]  }
 0x8ba   : > { %v925_v55 = vpop.f32.mrb[10].mxu0 }
 0x8bb   : > { %v1635_v56 = vpop.f32.mrb[11].mxu0 }
 0x919   : > { %v987_v57 = vpop.xlane.xlu0 %986 }
 0x91a   : > { %1756 = vrcp.f32 %v987_v57 }
 0x91d   : > { %v1091_v60 = vpop.permute.xlu0 %1090 }
 0x91e   : > { %v1096_v62 = vsel %vm612_vm4, %v1091_v60, 0 }
 0x921   : > { %v1089_v37 = vpop.permute.xlu0 %1088 }
 0x924   : > { %v1757_v58 = vpop.eup %1756 }
 0x925   : > { %v989_v59 = vmul.f32 %v1757_v58, %v1755_v48 }
 0x927   : > { %v990_v61 = vpack.c.bf16 %v989_v59, %v989_v59 }
 0x929   : > { %1645 = vmatmul.mubr.msk.bf16.vlgmr.msra.gmra.mrb[12].mxu0 %vm612_vm4, %v990_v61  ;;  %v1543_v61 = vld [vmem:[#allocation2] ss:$0 sm:$0xff] }
 0x92a   : > { %1655 = vmatpush3.bf16.xpose.msra.mxu0 %v1096_v62  ;;  %1656 = vmatprep.mubr.msk.bf16.mxu0 %vm1841_vm1, %v1840_v8 }
 0x92b   : > { %1666 = vmatprep.subr.bf16.mxu0 %v1840_v8 }
 0x931   : > { %1657 = vmatmul.mubr.msk.bf16.vlgmr.msra.gmra.mrb[16].mxu0 %vm612_vm4, %v1089_v37 }
 0x932   : > { %1668 = vmatprep.mubr.msk.bf16.mxu0 %vm1841_vm1, %v1840_v8 }
 0x9fc   : > { %v1033_v2 = vpop.f32.mrb[12].mxu0 }
 0x9fd   : > { %v1039_v3 = vpack.c.bf16 %v1033_v2, %v1033_v2  ;;  %v1646_v4 = vpop.f32.mrb[13].mxu0 }
 0x9fe   : > { %v1036_v5 = vpop.f32.mrb[14].mxu0  ;;  %v1740_v4 = vld [vmem:[%s2214_s12 + $0x10] sm:$0xff]  }
 0x9ff   : > { %v1647_v6 = vpop.f32.mrb[15].mxu0  ;;  %1651 = vmatmul.mubr.msk.bf16.vlgmr.msra.gmra.mrb[20].mxu1 %vm612_vm4, %v1039_v3  ;;  %v1741_v5 = vld [vmem:[%s2214_s12 + $0x18] sm:$0xff]  }
 0xa00   : > { %1662 = vmatprep.mubr.msk.bf16.mxu1 %vm1841_vm1, %v1840_v8  ;;  %v1545_v6 = vld [vmem:[%s2213_s11] ss:$0 sm:$0xff] }
 0xa04   : > { %v1132_v7 = vpop.f32.mrb[16].mxu0 }
 0xa05   : > { %v1133_v9 = vadd.f32 %v1132_v7, %v2070_v39  ;;  %v1658_v10 = vpop.f32.mrb[17].mxu0 }
 0xa06   : > { %v1135_v11 = vpop.f32.mrb[18].mxu0 }
 0xa07   : > { %v1659_v12 = vpop.f32.mrb[19].mxu0  ;;  %v1138_v13 = vsel %vm612_vm4, %v1133_v9, -inf }
 0xa08   : > { %1139 = vmax.xlane.f32.xlu1 %v1138_v13 }
 0xa19   : > { %1150 = vrot.lane.b32.xlu1 %v2053_v30, %s1852_s27  ;;  %v1204_v30 = vsel %vm676_vm5, %v1199_v20, 0 }
 0xa1a   : > { %1667 = vmatpush3.bf16.msra.mxu0 %v1204_v30 }
 0xa1b   : > { %1680 = vmatprep.subr.bf16.mxu0 %v1840_v8 }
 0xa95   : > { %v1140_v14 = vpop.xlane.xlu1 %1139 }
 0xa96   : > { %v1141_v15 = vsub.f32 %v1133_v9, %v1140_v14 }
 0xa98   : > { %v1142_v16 = vmul.f32 1.442695, %v1141_v15 }
 0xa99   : > { %v1151_v17 = vpop.permute.xlu1 %1150 }
 0xa9a   : > { %1758 = vpow2.f32 %v1142_v16  ;;  %v1156_v18 = vsel %vm676_vm5, %v1151_v17, 0 }
 0xa9b   : > { %1661 = vmatpush3.bf16.msra.mxu1 %v1156_v18 }
 0xa9c   : > { %1672 = vmatprep.subr.bf16.mxu1 %v1840_v8 }
 0xaa4   : > { %v1759_v39 = vpop.eup %1758 }
 0xaa5   : > { %v1144_v19 = vsel %vm612_vm4, %v1759_v39, 0.0 }
 0xaa6   : > { %1145 = vadd.xlane.f32.xlu0 %v1144_v19 }
 0xad2   : > { %v1081_v21 = vpop.f32.mrb[20].mxu1 }
 0xad3   : > { %v1087_v22 = vadd.f32 %v1081_v21, %v928_v53  ;;  %v1652_v23 = vpop.f32.mrb[21].mxu1 }
 0xad4   : > { %v1084_v24 = vpop.f32.mrb[22].mxu1 }
 0xad5   : > { %v1653_v25 = vpop.f32.mrb[23].mxu1 }
 0xb33   : > { %v1146_v26 = vpop.xlane.xlu0 %1145 }
 0xb34   : > { %1760 = vrcp.f32 %v1146_v26 }
 0xb3e   : > { %v1761_v27 = vpop.eup %1760 }
 0xb3f   : > { %v1148_v28 = vmul.f32 %v1761_v27, %v1759_v39 }
 0xb41   : > { %v1149_v29 = vpack.c.bf16 %v1148_v28, %v1148_v28 }
 0xb43   : > { %1663 = vmatmul.mubr.msk.bf16.vlgmr.msra.gmra.mrb[24].mxu1 %vm612_vm4, %v1149_v29 }
 0xb44   : > { %1676 = vmatprep.mubr.msk.bf16.mxu1 %vm1841_vm1, %v1840_v8  ;;  %1673 = vmatpush3.bf16.msra.mxu1 %v1736_v50 }
 0xb45   : > { %1674 = vmatprep.subr.bf16.mxu1 %v1840_v8 }
 0xc16   : > { %v1192_v31 = vpop.f32.mrb[24].mxu1 }
 0xc17   : > { %v1198_v32 = vpack.c.bf16 %v1192_v31, %v1192_v31  ;;  %v1664_v33 = vpop.f32.mrb[25].mxu1 }
 0xc18   : > { %v1195_v34 = vpop.f32.mrb[26].mxu1 }
 0xc19   : > { %v1665_v35 = vpop.f32.mrb[27].mxu1  ;;  %1669 = vmatmul.mubr.msk.bf16.vlgmr.msra.gmra.mrb[20].mxu0 %vm612_vm4, %v1198_v32 }
 0xc1a   : > { %1688 = vmatprep.mubr.msk.bf16.mxu0 %vm1841_vm1, %v1840_v8  ;;  %1681 = vmatpush3.bf16.msra.mxu0 %v1738_v51 }
 0xc1b   : > { %1682 = vmatprep.subr.bf16.mxu0 %v1840_v8 }
 0xc1e   : > { %1683 = vmatpush3.bf16.msra.mxu0 %v1739_v52 }
 0xc1f   : > { %1684 = vmatprep.subr.bf16.mxu0 %v1840_v8 }
 0xc22   : > { %1685 = vmatpush3.bf16.msra.mxu0 %v1740_v4 }
 0xc23   : > { %1686 = vmatprep.subr.bf16.mxu0 %v1840_v8  ;;  %v1549_v8 = vld [vmem:[%s2215_s13] ss:$0 sm:$0xff] }
 0xc26   : > { %1687 = vmatpush3.bf16.msra.mxu0 %v1741_v5 }
 0xcec   : > { %v1240_v36 = vpop.f32.mrb[20].mxu0 }
 0xced   : > { %v1246_v38 = vadd.f32 %v1240_v36, %v1087_v22  ;;  %v1670_v40 = vpop.f32.mrb[21].mxu0 }
 0xcee   : > { %v1243_v41 = vpop.f32.mrb[22].mxu0 }
 0xcef   : > { %v1247_v42 = vadd.f32 %v1246_v38, %v2021_v0  ;;  %v1671_v43 = vpop.f32.mrb[23].mxu0  ;;  %v1737_v0 = vld [vmem:[%s2212_s10 + $0x8] sm:$0xff]  }
 0xcf0   : > { %1675 = vmatpush3.bf16.msra.mxu1 %v1737_v0 }
 0xcf1   : > { %v1250_v44 = vsel %vm495_vm0, %v1247_v42, 0.0 }
 0xcf2   : > { %1251 = vadd.xlane.f32.xlu1 %v1250_v44 }
 0xd7f   : > { %v1252_v45 = vpop.xlane.xlu1 %1251 }
 0xd80   : > { %v1253_v46 = vmul.f32 0.03125, %v1252_v45 }
 0xd82   : > { %v1254_v47 = vsub.f32 %v1247_v42, %v1253_v46 }
 0xd84   : > { %v1255_v48 = vmul.f32 %v1254_v47, %v1254_v47  ;;  %v1275_v62 = vmul.f32 %v1543_v61, %v1254_v47 }
 0xd86   : > { %v1256_v49 = vsel %vm495_vm0, %v1255_v48, 0.0 }
 0xd87   : > { %1257 = vadd.xlane.f32.xlu0 %v1256_v49 }
 0xe14   : > { %v1258_v53 = vpop.xlane.xlu0 %1257 }
 0xe15   : > { %v1259_v54 = vmul.f32 0.032258064, %v1258_v53 }
 0xe17   : > { %1762 = vrsqrt.f32 %v1259_v54  ;;  %vm1262_vm6 = vcmp.eq.f32.partialorder %v1259_v54, inf  ;;  %v1265_v57 = vand.u32 2147483648, %v1259_v54  ;;  %vm1264_vm7 = vcmp.eq.f32.partialorder %v1259_v54, 0.0 }
 0xe21   : > { %v1763_v55 = vpop.eup %1762 }
 0xe22   : > { %v1261_v56 = vmul.f32 %v1763_v55, %v1259_v54 }
 0xe24   : > { %v1263_v58 = vsel %vm1262_vm6, %v1259_v54, %v1261_v56 }
 0xe25   : > { %v1266_v59 = vsel %vm1264_vm7, %v1265_v57, %v1263_v58 }
 0xe26   : > { %v1267_v60 = vadd.f32 1e-06, %v1266_v59 }
 0xe28   : > { %1764 = vrcp.f32 %v1267_v60 }
 0xe32   : > { %v1765_v37 = vpop.eup %1764 }
 0xe33   : > { %v1276_v1 = vmul.f32 %v1765_v37, %v1275_v62 }
 0xe35   : > { %v1283_v2 = vadd.f32 %v1544_v63, %v1276_v1 }
 0xe37   : > { %v1284_v3 = vpack.c.bf16 %v1283_v2, %v1283_v2 }
 0xe39   : > { %1677 = vmatmul.mubr.msk.bf16.vlgmr.msra.gmra.mrb[28].mxu1 %vm495_vm0, %v1284_v3 }
 0xf0c   : > { %v1345_v7 = vpop.f32.mrb[28].mxu1 }
 0xf0d   : > { %v1346_v9 = vadd.f32 %v1545_v6, %v1345_v7  ;;  %v1678_v10 = vpop.f32.mrb[29].mxu1 }
 0xf0e   : > { %v1348_v11 = vpop.f32.mrb[30].mxu1 }
 0xf0f   : > { %v1351_v12 = vmax.f32 %v1346_v9, 0.0  ;;  %v1679_v13 = vpop.f32.mrb[31].mxu1 }
 0xf11   : > { %v1352_v14 = vpack.c.bf16 %v1351_v12, %v1351_v12 }
 0xf13   : > { %1689 = vmatmul.mubr.msk.bf16.vlgmr.msra.gmra.mrb[24].mxu0 %vm1392_vm8, %v1352_v14 }
 0xfe6   : > { %v1430_v15 = vpop.f32.mrb[24].mxu0 }
 0xfe7   : > { %v1431_v16 = vadd.f32 %v1549_v8, %v1430_v15  ;;  %v1690_v17 = vpop.f32.mrb[25].mxu0 }
 0xfe8   : > { %v1433_v18 = vpop.f32.mrb[26].mxu0 }
 0xfe9   : > { %v1436_v39 = vadd.f32 %v1431_v16, %v1247_v42  ;;  %v1691_v19 = vpop.f32.mrb[27].mxu0 }
 0xfeb   : > { %1437 = vst.msk [vmem:[%s488_s22] sm:$0xff] %vm495_vm0, %v1436_v39 }
 0xfec PF: > { %s26_s29 = sadd.s32 1, %s1836_s29  }
 0xfed   : > { %p23_p5 = scmp.ge.s32.totalorder %s26_s29, 4  }
 0xfef   :  { %25 = sbr.rel (!%p23_p5) target bundleno = 2 (0x2), region = 115 }
 0xff6   :  { %1457 = vsyncpa [#allocation3], 1 }
 0xff7   :  { %1459 = vsyncpa [#allocation3 + $0x1], 1 }
 0xff8   :  { %1460 = vsyncpa [#allocation5], 1 }

</bundles_post_ra>
